<compile_context>
chip_gen: v7x
topology: tpu7x:2x2x1
jax: 0.10.0
libtpu: 0.0.40
codegen_flags: <defaults>
</compile_context>

<pallas_src>
import jax
import jax.numpy as jnp
from jax.experimental import pallas as pl
from jax.experimental.pallas import tpu as pltpu

D_IN, D_H1, D_H2, D_OUT = 100, 128, 256, 512


def generator_kernel(z_ref, w1_ref, b1_ref, w2_ref, b2_ref, w3_ref, b3_ref, o_ref):
    # Cast z f32 -> bf16 inside VMEM (hidden under the output-write DMA).
    z = z_ref[...].astype(jnp.bfloat16)
    # fc1 + relu (bf16 MXU operands, f32 accumulation, bf16 intermediates)
    x = jnp.dot(z, w1_ref[...], preferred_element_type=jnp.float32)
    x = jnp.maximum(x + b1_ref[...], 0.0).astype(jnp.bfloat16)
    # fc2 + relu
    x = jnp.dot(x, w2_ref[...], preferred_element_type=jnp.float32)
    x = jnp.maximum(x + b2_ref[...], 0.0).astype(jnp.bfloat16)
    # fc3 (no activation)
    x = jnp.dot(x, w3_ref[...], preferred_element_type=jnp.float32)
    o_ref[...] = (x + b3_ref[...]).astype(o_ref.dtype)


def prepare_params(params):
    """One-time conversion: bf16 weights in (in, out) layout, (1, D) f32 biases."""
    w1, b1, w2, b2, w3, b3 = params
    return (
        w1.astype(jnp.bfloat16),
        b1.reshape(1, D_H1).astype(jnp.float32),
        w2.astype(jnp.bfloat16),
        b2.reshape(1, D_H2).astype(jnp.float32),
        w3.astype(jnp.bfloat16),
        b3.reshape(1, D_OUT).astype(jnp.float32),
    )


def generator_forward(z, prepared_params, *, tb=None, out_dtype=jnp.float32):
    w1, b1, w2, b2, w3, b3 = prepared_params
    B = z.shape[0]

    if tb is None:
        if B <= 128:
            # Single block; a block dim equal to the full array dim is legal.
            tb = B
        else:
            # Largest power-of-two tile <= 1024 that still leaves >= 2 grid
            # steps (keeps both v7x TensorCores busy; on v5e/v6e the extra
            # steps only cost ~0.35 us each).
            tb = 128
            while tb < 1024 and B >= 4 * tb:
                tb *= 2

    grid = (pl.cdiv(B, tb),)

    out_itemsize = jnp.dtype(out_dtype).itemsize
    flops = 2 * B * (D_IN * D_H1 + D_H1 * D_H2 + D_H2 * D_OUT)
    bytes_accessed = (
        B * D_IN * 4                            # z (f32, read once)
        + (w1.size + w2.size + w3.size) * 2     # resident bf16 weights
        + (b1.size + b2.size + b3.size) * 4     # resident f32 biases
        + B * D_OUT * out_itemsize              # output
    )

    out = pl.pallas_call(
        generator_kernel,
        out_shape=jax.ShapeDtypeStruct((B, D_OUT), out_dtype),
        grid_spec=pltpu.PrefetchScalarGridSpec(
            num_scalar_prefetch=0,
            grid=grid,
            in_specs=[
                pl.BlockSpec((tb, D_IN), lambda i: (i, 0)),     # z tile (ragged last block OK)
                pl.BlockSpec((D_IN, D_H1), lambda i: (0, 0)),   # w1 (resident)
                pl.BlockSpec((1, D_H1), lambda i: (0, 0)),      # b1
                pl.BlockSpec((D_H1, D_H2), lambda i: (0, 0)),   # w2
                pl.BlockSpec((1, D_H2), lambda i: (0, 0)),      # b2
                pl.BlockSpec((D_H2, D_OUT), lambda i: (0, 0)),  # w3
                pl.BlockSpec((1, D_OUT), lambda i: (0, 0)),     # b3
            ],
            out_specs=pl.BlockSpec((tb, D_OUT), lambda i: (i, 0)),
        ),
        compiler_params=pltpu.CompilerParams(
            dimension_semantics=("parallel",),
            # Bump v5e's 16 MiB scoped default so tb up to ~2048 still fits;
            # equal to the v6e/v7x defaults, so harmless there.
            vmem_limit_bytes=32 * 1024 * 1024,
        ),
        cost_estimate=pl.CostEstimate(
            flops=flops, transcendentals=0, bytes_accessed=bytes_accessed),
    )(z, w1, b1, w2, b2, w3, b3)

    return out


def init_params(key):
    """Deterministic init mimicking PyTorch nn.Linear default (uniform +/- 1/sqrt(fan_in))."""
    ks = jax.random.split(key, 6)

    def lin(kw, kb, fan_in, fan_out):
        bound = 1.0 / jnp.sqrt(fan_in)
        w = jax.random.uniform(kw, (fan_in, fan_out), jnp.float32, -bound, bound)
        b = jax.random.uniform(kb, (fan_out,), jnp.float32, -bound, bound)
        return w, b

    w1, b1 = lin(ks[0], ks[1], D_IN, D_H1)
    w2, b2 = lin(ks[2], ks[3], D_H1, D_H2)
    w3, b3 = lin(ks[4], ks[5], D_H2, D_OUT)
    return (w1, b1, w2, b2, w3, b3)


def reference_forward(z, params):
    w1, b1, w2, b2, w3, b3 = params
    x = jnp.maximum(z @ w1 + b1, 0.0)
    x = jnp.maximum(x @ w2 + b2, 0.0)
    return x @ w3 + b3


if __name__ == "__main__":
    key = jax.random.PRNGKey(0)
    kz, kp = jax.random.split(key)

    B = 256  # small batch; tb=128 -> a 2-step "parallel" grid (both v7x TCs)
    z = jax.random.normal(kz, (B, D_IN), dtype=jnp.float32)
    params = init_params(kp)
    prepared = prepare_params(params)  # one-time weight conversion (cached)

    out = generator_forward(z, prepared)
    out = jax.block_until_ready(out)

    ref = reference_forward(z, params)  # full-f32 reference
    assert out.shape == (B, D_OUT)
    # bf16 MXU operands with f32 accumulation -> looser tolerance vs f32 ref
    assert jnp.allclose(out, ref, atol=5e-2, rtol=5e-2), "mismatch vs reference"

    print("KERNEL_OK")
</pallas_src>

<mosaic_0001>
module attributes {stable_mosaic.version = 11 : i64} {
  func.func @generator_kernel(%arg0: i32, %arg1: memref<128x100xf32, #tpu.memory_space<vmem>>, %arg2: memref<100x128xbf16, #tpu.memory_space<vmem>>, %arg3: memref<1x128xf32, #tpu.memory_space<vmem>>, %arg4: memref<128x256xbf16, #tpu.memory_space<vmem>>, %arg5: memref<1x256xf32, #tpu.memory_space<vmem>>, %arg6: memref<256x512xbf16, #tpu.memory_space<vmem>>, %arg7: memref<1x512xf32, #tpu.memory_space<vmem>>, %arg8: memref<128x512xf32, #tpu.memory_space<vmem>>) attributes {dimension_semantics = [#tpu.dimension_semantics<parallel>], iteration_bounds = array<i64: 2>, scalar_prefetch = 0 : i64, scratch_operands = 0 : i64, tpu.core_type = #tpu.core_type<tc>, window_params = [{transform_indices = @transform_0, window_bounds = array<i64: 128, 100>}, {pipeline_mode = #tpu.pipeline_mode<synchronous>, transform_indices = @transform_1, window_bounds = array<i64: 100, 128>}, {pipeline_mode = #tpu.pipeline_mode<synchronous>, transform_indices = @transform_2, window_bounds = array<i64: 1, 128>}, {pipeline_mode = #tpu.pipeline_mode<synchronous>, transform_indices = @transform_3, window_bounds = array<i64: 128, 256>}, {pipeline_mode = #tpu.pipeline_mode<synchronous>, transform_indices = @transform_4, window_bounds = array<i64: 1, 256>}, {pipeline_mode = #tpu.pipeline_mode<synchronous>, transform_indices = @transform_5, window_bounds = array<i64: 256, 512>}, {pipeline_mode = #tpu.pipeline_mode<synchronous>, transform_indices = @transform_6, window_bounds = array<i64: 1, 512>}, {transform_indices = @transform_7, window_bounds = array<i64: 128, 512>}]} {
    %c0 = arith.constant 0 : index
    %c0_0 = arith.constant 0 : index
    %0 = vector.load %arg1[%c0, %c0_0] : memref<128x100xf32, #tpu.memory_space<vmem>>, vector<128x100xf32>
    %1 = arith.truncf %0 : vector<128x100xf32> to vector<128x100xbf16>
    %c0_1 = arith.constant 0 : index
    %c0_2 = arith.constant 0 : index
    %2 = vector.load %arg2[%c0_1, %c0_2] : memref<100x128xbf16, #tpu.memory_space<vmem>>, vector<100x128xbf16>
    %cst = arith.constant dense<0.000000e+00> : vector<128x128xf32>
    %3 = tpu.matmul %1, %2, %cst {dimension_numbers = #tpu.dot_dimension_numbers<[1], [0], [0], [1], [0, 0, 1, 1], [], []>} : vector<128x100xbf16>, vector<100x128xbf16>, vector<128x128xf32> -> vector<128x128xf32>
    %c0_3 = arith.constant 0 : index
    %c0_4 = arith.constant 0 : index
    %4 = vector.load %arg3[%c0_3, %c0_4] : memref<1x128xf32, #tpu.memory_space<vmem>>, vector<1x128xf32>
    %5 = vector.broadcast %4 : vector<1x128xf32> to vector<128x128xf32>
    %6 = arith.addf %3, %5 : vector<128x128xf32>
    %cst_5 = arith.constant 0.000000e+00 : f32
    %7 = vector.broadcast %cst_5 : f32 to vector<128x128xf32>
    %8 = arith.maximumf %6, %7 : vector<128x128xf32>
    %9 = arith.truncf %8 : vector<128x128xf32> to vector<128x128xbf16>
    %c0_6 = arith.constant 0 : index
    %c0_7 = arith.constant 0 : index
    %10 = vector.load %arg4[%c0_6, %c0_7] : memref<128x256xbf16, #tpu.memory_space<vmem>>, vector<128x256xbf16>
    %cst_8 = arith.constant dense<0.000000e+00> : vector<128x256xf32>
    %11 = tpu.matmul %9, %10, %cst_8 {dimension_numbers = #tpu.dot_dimension_numbers<[1], [0], [0], [1], [0, 0, 1, 1], [], []>} : vector<128x128xbf16>, vector<128x256xbf16>, vector<128x256xf32> -> vector<128x256xf32>
    %c0_9 = arith.constant 0 : index
    %c0_10 = arith.constant 0 : index
    %12 = vector.load %arg5[%c0_9, %c0_10] : memref<1x256xf32, #tpu.memory_space<vmem>>, vector<1x256xf32>
    %13 = vector.broadcast %12 : vector<1x256xf32> to vector<128x256xf32>
    %14 = arith.addf %11, %13 : vector<128x256xf32>
    %cst_11 = arith.constant 0.000000e+00 : f32
    %15 = vector.broadcast %cst_11 : f32 to vector<128x256xf32>
    %16 = arith.maximumf %14, %15 : vector<128x256xf32>
    %17 = arith.truncf %16 : vector<128x256xf32> to vector<128x256xbf16>
    %c0_12 = arith.constant 0 : index
    %c0_13 = arith.constant 0 : index
    %18 = vector.load %arg6[%c0_12, %c0_13] : memref<256x512xbf16, #tpu.memory_space<vmem>>, vector<256x512xbf16>
    %cst_14 = arith.constant dense<0.000000e+00> : vector<128x512xf32>
    %19 = tpu.matmul %17, %18, %cst_14 {dimension_numbers = #tpu.dot_dimension_numbers<[1], [0], [0], [1], [0, 0, 1, 1], [], []>} : vector<128x256xbf16>, vector<256x512xbf16>, vector<128x512xf32> -> vector<128x512xf32>
    %c0_15 = arith.constant 0 : index
    %c0_16 = arith.constant 0 : index
    %20 = vector.load %arg7[%c0_15, %c0_16] : memref<1x512xf32, #tpu.memory_space<vmem>>, vector<1x512xf32>
    %21 = vector.broadcast %20 : vector<1x512xf32> to vector<128x512xf32>
    %22 = arith.addf %19, %21 : vector<128x512xf32>
    %c0_17 = arith.constant 0 : index
    %c0_18 = arith.constant 0 : index
    %23 = vector.load %arg8[%c0_17, %c0_18] : memref<128x512xf32, #tpu.memory_space<vmem>>, vector<128x512xf32>
    tpu.vector_store %arg8[%c0_17, %c0_18], %22 {strides = array<i32>} : memref<128x512xf32, #tpu.memory_space<vmem>>, vector<128x512xf32>,
    return
  }
  func.func @transform_0(%arg0: i32) -> (i32, i32) {
    %c0_i32 = arith.constant 0 : i32
    %c0_i32_0 = arith.constant 0 : i32
    return %arg0, %c0_i32 : i32, i32
  }
  func.func @transform_1(%arg0: i32) -> (i32, i32) {
    %c0_i32 = arith.constant 0 : i32
    %c0_i32_0 = arith.constant 0 : i32
    %c0_i32_1 = arith.constant 0 : i32
    return %c0_i32, %c0_i32_0 : i32, i32
  }
  func.func @transform_2(%arg0: i32) -> (i32, i32) {
    %c0_i32 = arith.constant 0 : i32
    %c0_i32_0 = arith.constant 0 : i32
    %c0_i32_1 = arith.constant 0 : i32
    return %c0_i32, %c0_i32_0 : i32, i32
  }
  func.func @transform_3(%arg0: i32) -> (i32, i32) {
    %c0_i32 = arith.constant 0 : i32
    %c0_i32_0 = arith.constant 0 : i32
    %c0_i32_1 = arith.constant 0 : i32
    return %c0_i32, %c0_i32_0 : i32, i32
  }
  func.func @transform_4(%arg0: i32) -> (i32, i32) {
    %c0_i32 = arith.constant 0 : i32
    %c0_i32_0 = arith.constant 0 : i32
    %c0_i32_1 = arith.constant 0 : i32
    return %c0_i32, %c0_i32_0 : i32, i32
  }
  func.func @transform_5(%arg0: i32) -> (i32, i32) {
    %c0_i32 = arith.constant 0 : i32
    %c0_i32_0 = arith.constant 0 : i32
    %c0_i32_1 = arith.constant 0 : i32
    return %c0_i32, %c0_i32_0 : i32, i32
  }
  func.func @transform_6(%arg0: i32) -> (i32, i32) {
    %c0_i32 = arith.constant 0 : i32
    %c0_i32_0 = arith.constant 0 : i32
    %c0_i32_1 = arith.constant 0 : i32
    return %c0_i32, %c0_i32_0 : i32, i32
  }
  func.func @transform_7(%arg0: i32) -> (i32, i32) {
    %c0_i32 = arith.constant 0 : i32
    %c0_i32_0 = arith.constant 0 : i32
    return %arg0, %c0_i32 : i32, i32
  }
}

</mosaic_0001>

<bundles_post_ra>
// kernel: tpu_custom_call.1
= control target key start
LH: loop header
LB: loop body
LE: loop exit
PB: predicated region body
PF: predicated region fallthrough
CT: control target
= control target key end

     0   :  { %12 = vsyncpa [#allocation3], 0  ;;  %s2527_s0 = inlined_call_operand.vmem [shape: f32[256,100], index: 0, kind: input, shape index: {}]   ;;  %s2528_s1 = inlined_call_operand.vmem [shape: bf16[100,128], index: 1, kind: input, shape index: {}]   ;;  %s2529_s2 = inlined_call_operand.vmem [shape: f32[1,128], index: 2, kind: input, shape index: {}]   ;;  %s2530_s3 = inlined_call_operand.vmem [shape: bf16[128,256], index: 3, kind: input, shape index: {}]   ;;  %s2531_s4 = inlined_call_operand.vmem [shape: f32[1,256], index: 4, kind: input, shape index: {}]   ;;  %s2532_s5 = inlined_call_operand.hbm [shape: bf16[256,512], index: 5, kind: input, shape index: {}]   ;;  %s2533_s6 = inlined_call_operand.vmem [shape: f32[1,512], index: 6, kind: input, shape index: {}]   ;;  %s2534_s7 = inlined_call_operand.hbm [shape: f32[256,512], index: 7, kind: output, shape index: {}]  }
   0x1   :  { %13 = vsyncpa [#allocation4], 0 }
   0x2   :  { %15 = vsyncpa [#allocation4 + $0x1], 0  ;;  %s2067_s24 = smov 0   ;;  %s2069_s25 = smov 0  }
   0x3   :  { %s2071_s26 = smov 0   ;;  %s2073_s27 = smov 0  }
   0x4 LB: > { %s2088_s28 = sadd.s32 4294967295, %s2018_s27   ;;  %s1583_s29 = sadd.s32 4294967294, %s2018_s27   ;;  %s2018_s27 = sphi %s2073_s27, %s2550_s27   ;;  %s2014_s26 = sphi %s2071_s26, %s2549_s26   ;;  %s2010_s25 = sphi %s2069_s25, %s2548_s25   ;;  %s2006_s24 = sphi %s2067_s24, %s2547_s24  }
   0x5   : > { %s2092_s30 = sadd.s32 1, %s2018_s27   ;;  %s180_s8 = sadd.s32 1, %s2014_s26 }
   0x6   : > { %s177_s9 = ssub.s32 %s2018_s27, %s2092_s30  ;;  %p190_p0 = scmp.ne.s32.totalorder %s2014_s26, %s2010_s25 }
   0x7   : > { %p178_p1 = scmp.eq.s32.totalorder %s177_s9, 0  ;;  %p191_p2 = scmp.eq.s32.totalorder %s2088_s28, 1 }
   0x8   : > { %p196_p3 = scmp.ne.s32.totalorder %s2010_s25, %s2006_s24  ;;  %p197_p4 = scmp.eq.s32.totalorder %s1583_s29, 1 }
   0x9   : > { %s2103_s10 = scalar_select %p178_p1, %s2014_s26, %s180_s8  }
   0xa   : > { %p2105_p5 = por %p191_p2, %p190_p0  ;;  %p2109_p6 = por %p197_p4, %p196_p3 }
   0xb   : > { %p1584_p7 = scmp.ge.s32.totalorder %s2018_s27, 1  ;;  %p204_p8 = scmp.lt.s32.totalorder %s2018_s27, 3 }
   0xc   : > { %s2538_s11 = scalar_select %p2105_p5, 1, 0 }
   0xd   : > { %s2539_s12 = scalar_select %p2109_p6, 1, 0 }
   0xe   : > { %p2535_p9 = scmp.eq.s32.totalorder %s2088_s28, 0  ;;  %p2116_p10 = pnand %p1584_p7, %p204_p8 }
   0xf   : > { %s2020_s14 = smov [#allocation2]   ;;  %s1924_s19 = scalar_lea.hbm %s2532_s5, 8192 }
  0x10   : > { %s2540_s13 = scalar_select %p2116_p10, 1, 0 }
  0x11   : > { %s228_s15 = sshll.u32 %s2020_s14, 4  ;;  %p1748_p11 = pneg %p2116_p10  ;;  %s229_s15 = int_to_ptr.vmem [resolvable:$true] %s228_s15 }
  0x12   : > { %p1925_p13 = scmp.ne.s32.totalorder %s2532_s5, %s1924_s19  ;;  %p1931_p3 = scmp.lt.u32.totalorder %s1924_s19, %s2532_s5 }
  0x13   : > { %p2124_p12 = pnand %p2535_p9, %p1748_p11 }
  0x15   : > { %p1926_p0 = pneg %p2124_p12 }
  0x17   : > { %p1927_p1 = pnand %p1926_p0, %p1925_p13 }
  0x19   : > { %p1928_p2 = pneg %p1927_p1 }
  0x1b   : > { %p1933_p4 = pnand %p1931_p3, %p1928_p2 }
  0x1d   : > { %1936 = shalt.err (!%p1933_p4)
}
  0x1e   : > { %s1937_s29 = scalar_lea.vmem %s229_s15, 8192  ;;  %p1945_p9 = scmp.lt.s32.totalorder %s229_s15, %s229_s15 }
  0x1f   : > { %p1938_p7 = scmp.ne.s32.totalorder %s229_s15, %s1937_s29  ;;  %p1946_p6 = scmp.lt.s32.totalorder %s1937_s29, %s1937_s29 }
  0x21   : > { %p1940_p8 = pnand %p1938_p7, %p1926_p0  ;;  %p1947_p5 = por %p1946_p6, %p1945_p9 }
  0x23   : > { %p1941_p11 = pneg %p1940_p8 }
  0x25   : > { %p1948_p10 = pnand %p1947_p5, %p1941_p11 }
  0x27   : > { %1951 = shalt.err (!%p1948_p10)
}
  0x28   : > { %s2021_s8 = smov 256   ;;  %s2022_s9 = smov 16  }
  0x29   : > { %1751 = dma.hbm_to_vmem [thread:$0]  (!%p2124_p12), %s2532_s5, 8192, %s229_s15, [#allocation3], %s2021_s8, %s2021_s8, %s2022_s9  }
  0x2a   : > { %p2542_p13 = scmp.ne.s32.totalorder %s2540_s13, 0 }
  0x2b   : > { %p2543_p1 = scmp.eq.s32.totalorder (!%p2542_p13), %s2088_s28, 0 }
  0x2c   : > { %256 = sbr.rel (%p2542_p13) target bundleno = 812 (0x32c), region = 48 }
  0x33   : > { %1997 = dma.done.wait (%p2543_p1), [#allocation3], 8192   ;;  %p2544_p0 = pmov %p2543_p1 }
  0x34   : > { %s1590_s18 = sshll.u32 %s2088_s28, 4  ;;  %v1797_v0 = vld [vmem:[%s2528_s1] sm:$0xff]   ;;  %v1798_v1 = vld [vmem:[%s2528_s1 + $0x8] sm:$0xff]   ;;  %v1799_v2 = vld [vmem:[%s2528_s1 + $0x10] sm:$0xff]   ;;  %vm379_vm0 = vcmask 818176   ;;  %vm404_vm1 = vcmask 1041408  }
  0x35   : > { %1999 = vsyncadd (%p2544_p0), [#allocation3], 4294959104  ;;  %p289_p5 = scmp.lt.s32.totalorder %s1590_s18, 31  ;;  %1711 = vmatprep.subr.bf16.mxu0 %v1797_v0  ;;  %v1800_v5 = vld [vmem:[%s2528_s1 + $0x18] sm:$0xff]   ;;  %v1801_v7 = vld [vmem:[%s2528_s1 + $0x20] sm:$0xff]   ;;  %v2023_v48 = vmov 0  }
  0x36   : > { %1712 = vmatpush3.bf16.msra.mxu0 %v1797_v0  ;;  %v1804_v8 = vld [vmem:[%s2530_s3 + $0x4] ss:$8 sps:$4 sm:$0xff]   ;;  %v1806_v9 = vld [vmem:[%s2530_s3] ss:$8 sps:$4 sm:$0xff]   ;;  %v1807_v10 = vld [vmem:[%s2530_s3 + $0x14] ss:$8 sps:$4 sm:$0xff]   ;;  %669 = vmatprep.mubr.bf16.mxu1 %v2023_v48 }
  0x37   : > { %s2552_s18 = smov (!%p289_p5, %s1590_s18), 31  ;;  %1713 = vmatprep.subr.bf16.mxu0 %v1798_v1  ;;  %637 = vmatprep.subr.bf16.mxu1 %v1804_v8  ;;  %v1802_v11 = vld [vmem:[%s2528_s1 + $0x28] sm:$0xff]   ;;  %v1809_v12 = vld [vmem:[%s2530_s3 + $0x10] ss:$8 sps:$4 sm:$0xff]   ;;  %v1813_v16 = vld [vmem:[%s2530_s3 + $0x34] ss:$8 sps:$4 sm:$0xff]  }
  0x38   : > { %s1591_s16 = sshll.u32 %s2552_s18, 3  ;;  %638 = vmatpush1.bf16.msra.mxu1 %v1806_v9  ;;  %v1810_v13 = vld [vmem:[%s2530_s3 + $0x24] ss:$8 sps:$4 sm:$0xff]   ;;  %v1803_v14 = vld [vmem:[%s2528_s1 + $0x30] ss:$0 sps:$4 sm:$0x33]  }
  0x39   : > { %s2160_s23 = scalar_lea.vmem %s2527_s0, %s1591_s16  ;;  %639 = vmatprep.subr.bf16.mxu1 %v1807_v10  ;;  %v1812_v15 = vld [vmem:[%s2530_s3 + $0x20] ss:$8 sps:$4 sm:$0xff]   ;;  %v1815_v19 = vld [vmem:[%s2530_s3 + $0x30] ss:$8 sps:$4 sm:$0xff]   ;;  %v1816_v22 = vld [vmem:[%s2530_s3 + $0x44] ss:$8 sps:$4 sm:$0xff]  }
  0x3a   : > { %v296_v3 = vld [vmem:[%s2160_s23] sm:$0xff]  ;;  %1714 = vmatpush3.bf16.msra.mxu0 %v1798_v1  ;;  %v297_v4 = vld [vmem:[%s2160_s23 + $0x8] sm:$0xff]  ;;  %v298_v17 = vld [vmem:[%s2160_s23 + $0x10] sm:$0xff]  ;;  %v406_v23 = vsel %vm404_vm1, %v1803_v14, 0  ;;  %s285_s19 = sand.u32 1, %s2010_s25   ;;  %s1695_s13 = sshll.u32 %s2088_s28, 13 }
  0x3b   : > { %1715 = vmatprep.subr.bf16.mxu0 %v1799_v2  ;;  %v312_v6 = vpack.c.bf16 %v297_v4, %v296_v3  ;;  %v299_v18 = vld [vmem:[%s2160_s23 + $0x18] sm:$0xff]  ;;  %v300_v20 = vld [vmem:[%s2160_s23 + $0x20] sm:$0xff]  ;;  %v301_v21 = vld [vmem:[%s2160_s23 + $0x28] sm:$0xff]  ;;  %s1589_s21 = sshll.u32 %s285_s19, 9  ;;  %s2472_s8 = scalar_lea.hbm %s2534_s7, %s1695_s13 }
  0x3c   : > { %640 = vmatpush1.bf16.msra.mxu1 %v1809_v12  ;;  %v1818_v24 = vld [vmem:[%s2530_s3 + $0x40] ss:$8 sps:$4 sm:$0xff]   ;;  %v313_v25 = vpack.c.bf16 %v299_v18, %v298_v17  ;;  %v1819_v26 = vld [vmem:[%s2530_s3 + $0x54] ss:$8 sps:$4 sm:$0xff]   ;;  %v314_v27 = vpack.c.bf16 %v301_v21, %v300_v20  ;;  %v1821_v30 = vld [vmem:[%s2530_s3 + $0x50] ss:$8 sps:$4 sm:$0xff]  }
  0x3d   : > { %1725 = vmatprep.mubr.msk.bf16.mxu0 %vm379_vm0, %v312_v6  ;;  %641 = vmatprep.subr.bf16.mxu1 %v1810_v13  ;;  %v302_v28 = vld [vmem:[%s2160_s23 + $0x30] sm:$0xff]  ;;  %v303_v29 = vld [vmem:[%s2160_s23 + $0x38] sm:$0xff]  ;;  %v304_v31 = vld [vmem:[%s2160_s23 + $0x40] sm:$0xff]  ;;  %s2349_s15 = scalar_lea.vmem [#allocation5], %s1589_s21  ;;  %s2486_s9 = scalar_lea.sflag [#allocation4], %s285_s19 }
  0x3e   : > { %1716 = vmatpush3.bf16.msra.mxu0 %v1799_v2  ;;  %v305_v32 = vld [vmem:[%s2160_s23 + $0x48] sm:$0xff]  ;;  %v315_v33 = vpack.c.bf16 %v303_v29, %v302_v28  ;;  %v306_v35 = vld [vmem:[%s2160_s23 + $0x50] sm:$0xff]  ;;  %v307_v36 = vld [vmem:[%s2160_s23 + $0x58] sm:$0xff]  ;;  %s1509_s22 = sshll.u32 %s2349_s15, 4  ;;  %p2545_p9 = scmp.ne.s32.totalorder %s2538_s11, 0  ;;  %s2474_s22 = int_to_ptr.vmem [resolvable:$true] %s1509_s22 }
  0x3f   : > { %1717 = vmatprep.subr.bf16.mxu0 %v1800_v5  ;;  %v316_v34 = vpack.c.bf16 %v305_v32, %v304_v31  ;;  %v308_v37 = vld [vmem:[%s2160_s23 + $0x60] sm:$0xff]  ;;  %v309_v38 = vld [vmem:[%s2160_s23 + $0x68] sm:$0xff]  ;;  %v317_v39 = vpack.c.bf16 %v307_v36, %v306_v35  ;;  %v310_v41 = vld [vmem:[%s2160_s23 + $0x70] sm:$0xff]  ;;  %s2024_s14 = smov [#allocation5]  }
  0x40   : > { %642 = vmatpush1.bf16.msra.mxu1 %v1812_v15  ;;  %v318_v40 = vpack.c.bf16 %v309_v38, %v308_v37  ;;  %v311_v42 = vld [vmem:[%s2160_s23 + $0x78] sm:$0xff]  ;;  %v1822_v44 = vld [vmem:[%s2530_s3 + $0x64] ss:$8 sps:$4 sm:$0xff]   ;;  %v1824_v45 = vld [vmem:[%s2530_s3 + $0x60] ss:$8 sps:$4 sm:$0xff]   ;;  %s1952_s23 = scalar_lea.vmem %s2474_s22, 8192 }
  0x41   : > { %643 = vmatprep.subr.bf16.mxu1 %v1813_v16  ;;  %v319_v43 = vpack.c.bf16 %v311_v42, %v310_v41  ;;  %v1825_v46 = vld [vmem:[%s2530_s3 + $0x74] ss:$8 sps:$4 sm:$0xff]   ;;  %v1827_v47 = vld [vmem:[%s2530_s3 + $0x70] ss:$8 sps:$4 sm:$0xff]   ;;  %p1953_p6 = scmp.ne.s32.totalorder %s2474_s22, %s1952_s23  ;;  %s1956_s17 = sshll.u32 %s2024_s14, 4  ;;  %s1957_s17 = int_to_ptr.vmem [resolvable:$false] %s1956_s17 }
  0x42   : > { %1718 = vmatpush3.bf16.msra.mxu0 %v1800_v5  ;;  %v1830_v49 = vld [vmem:[#allocation2 + $0xc] ss:$16 sps:$4 sm:$0xff]   ;;  %v1831_v50 = vld [vmem:[#allocation2] ss:$16 sps:$4 sm:$0xff]   ;;  %v1833_v51 = vld [vmem:[#allocation2 + $0x4] ss:$16 sps:$4 sm:$0xff]   ;;  %p1959_p2 = scmp.lt.s32.totalorder %s2474_s22, %s1957_s17 }
  0x43   : > { %1719 = vmatprep.subr.bf16.mxu0 %v1801_v7  ;;  %v1839_v52 = vld [vmem:[#allocation2 + $0x24] ss:$16 sps:$4 sm:$0xff]   ;;  %v1837_v53 = vld [vmem:[#allocation2 + $0x20] ss:$16 sps:$4 sm:$0xff]   ;;  %v1828_v28 = vld [vmem:[#allocation2 + $0x8] ss:$16 sps:$4 sm:$0xff]   ;;  %p1954_p10 = pnand %p1953_p6, %p2545_p9 }
  0x44   : > { %644 = vmatpush1.bf16.msra.mxu1 %v1815_v19  ;;  %v1845_v54 = vld [vmem:[#allocation2 + $0x44] ss:$16 sps:$4 sm:$0xff]   ;;  %v1843_v55 = vld [vmem:[#allocation2 + $0x40] ss:$16 sps:$4 sm:$0xff]   ;;  %v1836_v31 = vld [vmem:[#allocation2 + $0x2c] ss:$16 sps:$4 sm:$0xff]  }
  0x45   : > { %645 = vmatprep.subr.bf16.mxu1 %v1816_v22  ;;  %v1851_v56 = vld [vmem:[#allocation2 + $0x64] ss:$16 sps:$4 sm:$0xff]   ;;  %v1849_v57 = vld [vmem:[#allocation2 + $0x60] ss:$16 sps:$4 sm:$0xff]   ;;  %v1842_v42 = vld [vmem:[#allocation2 + $0x4c] ss:$16 sps:$4 sm:$0xff]   ;;  %p1955_p12 = pneg %p1954_p10 }
  0x46   : > { %1720 = vmatpush3.bf16.msra.mxu0 %v1801_v7  ;;  %v1857_v58 = vld [vmem:[#allocation2 + $0x84] ss:$16 sps:$4 sm:$0xff]   ;;  %v1855_v59 = vld [vmem:[#allocation2 + $0x80] ss:$16 sps:$4 sm:$0xff]   ;;  %s1958_s18 = scalar_lea.vmem %s1957_s17, 16384 }
  0x47   : > { %1721 = vmatprep.subr.bf16.mxu0 %v1802_v11  ;;  %v1863_v60 = vld [vmem:[#allocation2 + $0xa4] ss:$16 sps:$4 sm:$0xff]   ;;  %v1861_v61 = vld [vmem:[#allocation2 + $0xa0] ss:$16 sps:$4 sm:$0xff]   ;;  %p1960_p3 = scmp.lt.s32.totalorder %s1958_s18, %s1952_s23 }
  0x48   : > { %646 = vmatpush1.bf16.msra.mxu1 %v1818_v24  ;;  %v1869_v62 = vld [vmem:[#allocation2 + $0xc4] ss:$16 sps:$4 sm:$0xff]   ;;  %v1867_v63 = vld [vmem:[#allocation2 + $0xc0] ss:$16 sps:$4 sm:$0xff]  }
  0x49   : > { %647 = vmatprep.subr.bf16.mxu1 %v1819_v26  ;;  %v1875_v0 = vld [vmem:[#allocation2 + $0xe4] ss:$16 sps:$4 sm:$0xff]   ;;  %v1873_v1 = vld [vmem:[#allocation2 + $0xe0] ss:$16 sps:$4 sm:$0xff]   ;;  %p1961_p4 = por %p1960_p3, %p1959_p2 }
  0x4a   : > { %1722 = vmatpush3.bf16.msra.mxu0 %v1802_v11  ;;  %v1881_v2 = vld [vmem:[#allocation2 + $0x104] ss:$16 sps:$4 sm:$0xff]   ;;  %v1879_v3 = vld [vmem:[#allocation2 + $0x100] ss:$16 sps:$4 sm:$0xff]  }
  0x4b   : > { %1741 = vmatprep.subr.msk.bf16.mxu0 %vm404_vm1, %v1803_v14  ;;  %v1887_v4 = vld [vmem:[#allocation2 + $0x124] ss:$16 sps:$4 sm:$0xff]   ;;  %v1885_v5 = vld [vmem:[#allocation2 + $0x120] ss:$16 sps:$4 sm:$0xff]   ;;  %p1962_p7 = pnand %p1961_p4, %p1955_p12 }
  0x4c   : > { %648 = vmatpush1.bf16.msra.mxu1 %v1821_v30  ;;  %v1893_v6 = vld [vmem:[#allocation2 + $0x144] ss:$16 sps:$4 sm:$0xff]   ;;  %v1891_v7 = vld [vmem:[#allocation2 + $0x140] ss:$16 sps:$4 sm:$0xff]  }
  0x4d   : > { %649 = vmatprep.subr.bf16.mxu1 %v1822_v44  ;;  %v1899_v8 = vld [vmem:[#allocation2 + $0x164] ss:$16 sps:$4 sm:$0xff]   ;;  %v1897_v9 = vld [vmem:[#allocation2 + $0x160] ss:$16 sps:$4 sm:$0xff]  }
  0x4e   : > { %1724 = vmatpush3.bf16.msra.mxu0 %v406_v23  ;;  %v1905_v10 = vld [vmem:[#allocation2 + $0x184] ss:$16 sps:$4 sm:$0xff]   ;;  %v1903_v11 = vld [vmem:[#allocation2 + $0x180] ss:$16 sps:$4 sm:$0xff]  }
  0x4f   : > { %1204 = vmatprep.subr.bf16.mxu0 %v1833_v51  ;;  %v1911_v12 = vld [vmem:[#allocation2 + $0x1a4] ss:$16 sps:$4 sm:$0xff]   ;;  %v1909_v13 = vld [vmem:[#allocation2 + $0x1a0] ss:$16 sps:$4 sm:$0xff]  }
  0x50   : > { %650 = vmatpush1.bf16.msra.mxu1 %v1824_v45  ;;  %v2253_v14 = vld [vmem:[%s2529_s2] ss:$0 sm:$0xff] }
  0x51   : > { %1726 = vmatmul.mubr.msk.bf16.vlgmr.msra.gmra.mrb[0].mxu0 %vm379_vm0, %v313_v25  ;;  %651 = vmatprep.subr.bf16.mxu1 %v1825_v46  ;;  %v1840_v46 = vld [vmem:[#allocation2 + $0x48] ss:$16 sps:$4 sm:$0xff]  }
  0x52   : > { %1729 = vmatprep.mubr.msk.bf16.mxu0 %vm379_vm0, %v314_v27  ;;  %1205 = vmatpush1.bf16.msra.mxu0 %v1831_v50  ;;  %v1848_v50 = vld [vmem:[#allocation2 + $0x6c] ss:$16 sps:$4 sm:$0xff]  }
  0x53   : > { %1206 = vmatprep.subr.bf16.mxu0 %v1839_v52 }
  0x54   : > { %652 = vmatpush1.bf16.msra.mxu1 %v1827_v47 }
  0x55   : > { %1317 = vmatprep.subr.bf16.mxu1 %v1830_v49 }
  0x56   : > { %1207 = vmatpush1.bf16.msra.mxu0 %v1837_v53 }
  0x57   : > { %1208 = vmatprep.subr.bf16.mxu0 %v1845_v54 }
  0x59   : > { %1730 = vmatmul.mubr.msk.bf16.gmra.mrb[4].mxu0 %vm379_vm0, %v315_v33 }
  0x5a   : > { %1733 = vmatprep.mubr.msk.bf16.mxu0 %vm379_vm0, %v316_v34  ;;  %1209 = vmatpush1.bf16.msra.mxu0 %v1843_v55 }
  0x5b   : > { %1210 = vmatprep.subr.bf16.mxu0 %v1851_v56 }
  0x5e   : > { %1211 = vmatpush1.bf16.msra.mxu0 %v1849_v57 }
  0x5f   : > { %1212 = vmatprep.subr.bf16.mxu0 %v1857_v58  ;;  %v1846_v58 = vld [vmem:[#allocation2 + $0x68] ss:$16 sps:$4 sm:$0xff]  }
  0x61   : > { %1734 = vmatmul.mubr.msk.bf16.gmra.mrb[8].mxu0 %vm379_vm0, %v317_v39  ;;  %v1834_v39 = vld [vmem:[#allocation2 + $0x28] ss:$16 sps:$4 sm:$0xff]  }
  0x62   : > { %1737 = vmatprep.mubr.msk.bf16.mxu0 %vm379_vm0, %v318_v40  ;;  %1213 = vmatpush1.bf16.msra.mxu0 %v1855_v59 }
  0x63   : > { %1214 = vmatprep.subr.bf16.mxu0 %v1863_v60 }
  0x66   : > { %1215 = vmatpush1.bf16.msra.mxu0 %v1861_v61  ;;  %v1854_v61 = vld [vmem:[#allocation2 + $0x8c] ss:$16 sps:$4 sm:$0xff]  }
  0x67   : > { %1216 = vmatprep.subr.bf16.mxu0 %v1869_v62 }
  0x69   : > { %1738 = vmatmul.mubr.msk.bf16.gmra.mrb[12].mxu0 %vm379_vm0, %v319_v43 }
  0x6a   : > { %1217 = vmatpush1.bf16.msra.mxu0 %v1867_v63 }
  0x6b   : > { %1218 = vmatprep.subr.bf16.mxu0 %v1875_v0 }
  0x6e   : > { %1219 = vmatpush1.bf16.msra.mxu0 %v1873_v1  ;;  %v1852_v1 = vld [vmem:[#allocation2 + $0x88] ss:$16 sps:$4 sm:$0xff]  }
  0x6f   : > { %1220 = vmatprep.subr.bf16.mxu0 %v1881_v2 }
  0x72   : > { %1221 = vmatpush1.bf16.msra.mxu0 %v1879_v3 }
  0x73   : > { %1222 = vmatprep.subr.bf16.mxu0 %v1887_v4  ;;  %v1860_v4 = vld [vmem:[#allocation2 + $0xac] ss:$16 sps:$4 sm:$0xff]  }
  0x76   : > { %1223 = vmatpush1.bf16.msra.mxu0 %v1885_v5 }
  0x77   : > { %1224 = vmatprep.subr.bf16.mxu0 %v1893_v6 }
  0x7a   : > { %1225 = vmatpush1.bf16.msra.mxu0 %v1891_v7 }
  0x7b   : > { %1226 = vmatprep.subr.bf16.mxu0 %v1899_v8 }
  0x7e   : > { %1227 = vmatpush1.bf16.msra.mxu0 %v1897_v9 }
  0x7f   : > { %1228 = vmatprep.subr.bf16.mxu0 %v1905_v10 }
  0x82   : > { %1229 = vmatpush1.bf16.msra.mxu0 %v1903_v11 }
  0x83   : > { %1230 = vmatprep.subr.bf16.mxu0 %v1911_v12  ;;  %v1858_v12 = vld [vmem:[#allocation2 + $0xa8] ss:$16 sps:$4 sm:$0xff]  }
  0x86   : > { %1231 = vmatpush1.bf16.msra.mxu0 %v1909_v13 }
 0x124   : > { %v1727_v15 = vpop.f32.mrb[0].mxu0 }
 0x125   : > { %v451_v16 = vadd.f32 %v1727_v15, %v2253_v14  ;;  %v442_v17 = vpop.f32.mrb[1].mxu0 }
 0x126   : > { %v443_v18 = vadd.f32 %v2253_v14, %v442_v17  ;;  %v1728_v19 = vpop.f32.mrb[2].mxu0 }
 0x127   : > { %v454_v20 = vadd.f32 %v1728_v19, %v2253_v14  ;;  %v445_v21 = vpop.f32.mrb[3].mxu0  ;;  %v507_v23 = vmax.f32 %v451_v16, 0.0  ;;  %v1866_v16 = vld [vmem:[#allocation2 + $0xcc] ss:$16 sps:$4 sm:$0xff]  }
 0x128   : > { %v446_v22 = vadd.f32 %v2253_v14, %v445_v21  ;;  %v505_v25 = vmax.f32 %v443_v18, 0.0 }
 0x129   : > { %v508_v24 = vmax.f32 %v454_v20, 0.0  ;;  %v1864_v20 = vld [vmem:[#allocation2 + $0xc8] ss:$16 sps:$4 sm:$0xff]  }
 0x12a   : > { %v506_v26 = vmax.f32 %v446_v22, 0.0  ;;  %v1872_v22 = vld [vmem:[#allocation2 + $0xec] ss:$16 sps:$4 sm:$0xff]  }
 0x12b   : > { %v522_v27 = vpack.c.bf16 %v508_v24, %v507_v23  ;;  %v1870_v23 = vld [vmem:[#allocation2 + $0xe8] ss:$16 sps:$4 sm:$0xff]   ;;  %v1878_v24 = vld [vmem:[#allocation2 + $0x10c] ss:$16 sps:$4 sm:$0xff]  }
 0x12c   : > { %v521_v29 = vpack.c.bf16 %v506_v26, %v505_v25  ;;  %v1731_v30 = vpop.f32.mrb[4].mxu0  ;;  %v1876_v25 = vld [vmem:[#allocation2 + $0x108] ss:$16 sps:$4 sm:$0xff]  }
 0x12d   : > { %v467_v32 = vadd.f32 %v1731_v30, %v2253_v14  ;;  %v458_v33 = vpop.f32.mrb[5].mxu0  ;;  %v1882_v26 = vld [vmem:[#allocation2 + $0x128] ss:$16 sps:$4 sm:$0xff]  }
 0x12e   : > { %670 = vmatmul.mubr.bf16.vlgmr.msra.gmra.mrb[0].mxu1 %v521_v29  ;;  %v459_v34 = vadd.f32 %v2253_v14, %v458_v33  ;;  %v1732_v35 = vpop.f32.mrb[6].mxu0  ;;  %v1896_v29 = vld [vmem:[#allocation2 + $0x16c] ss:$16 sps:$4 sm:$0xff]   ;;  %v1894_v30 = vld [vmem:[#allocation2 + $0x168] ss:$16 sps:$4 sm:$0xff]  }
 0x12f   : > { %v511_v36 = vmax.f32 %v467_v32, 0.0  ;;  %v470_v37 = vadd.f32 %v1732_v35, %v2253_v14  ;;  %v461_v38 = vpop.f32.mrb[7].mxu0  ;;  %679 = vmatprep.mubr.bf16.mxu1 %v2023_v48  ;;  %1318 = vmatpush1.bf16.msra.mxu1 %v1828_v28  ;;  %v1888_v28 = vld [vmem:[#allocation2 + $0x148] ss:$16 sps:$4 sm:$0xff]   ;;  %v1908_v33 = vld [vmem:[#allocation2 + $0x1ac] ss:$16 sps:$4 sm:$0xff]  }
 0x130   : > { %v509_v40 = vmax.f32 %v459_v34, 0.0  ;;  %v462_v41 = vadd.f32 %v2253_v14, %v461_v38  ;;  %1319 = vmatprep.subr.bf16.mxu1 %v1836_v31  ;;  %v1902_v31 = vld [vmem:[#allocation2 + $0x18c] ss:$16 sps:$4 sm:$0xff]   ;;  %v1900_v32 = vld [vmem:[#allocation2 + $0x188] ss:$16 sps:$4 sm:$0xff]  }
 0x131   : > { %v512_v43 = vmax.f32 %v470_v37, 0.0  ;;  %v1906_v34 = vld [vmem:[#allocation2 + $0x1a8] ss:$16 sps:$4 sm:$0xff]   ;;  %v1914_v35 = vld [vmem:[#allocation2 + $0x1cc] ss:$16 sps:$4 sm:$0xff]  }
 0x132   : > { %v510_v44 = vmax.f32 %v462_v41, 0.0  ;;  %v1912_v37 = vld [vmem:[#allocation2 + $0x1c8] ss:$16 sps:$4 sm:$0xff]   ;;  %v1915_v38 = vld [vmem:[#allocation2 + $0x1c0] ss:$16 sps:$4 sm:$0xff]  }
 0x133   : > { %v524_v45 = vpack.c.bf16 %v512_v43, %v511_v36  ;;  %1320 = vmatpush1.bf16.msra.mxu1 %v1834_v39  ;;  %v1917_v36 = vld [vmem:[#allocation2 + $0x1c4] ss:$16 sps:$4 sm:$0xff]   ;;  %v1920_v39 = vld [vmem:[#allocation2 + $0x1ec] ss:$16 sps:$4 sm:$0xff]   ;;  %v1918_v41 = vld [vmem:[#allocation2 + $0x1e8] ss:$16 sps:$4 sm:$0xff]  }
 0x134   : > { %v523_v47 = vpack.c.bf16 %v510_v44, %v509_v40  ;;  %v1735_v49 = vpop.f32.mrb[8].mxu0  ;;  %1321 = vmatprep.subr.bf16.mxu1 %v1842_v42  ;;  %1232 = vmatprep.subr.bf16.mxu0 %v1917_v36  ;;  %v1923_v40 = vld [vmem:[#allocation2 + $0x1e4] ss:$16 sps:$4 sm:$0xff]   ;;  %v1921_v42 = vld [vmem:[#allocation2 + $0x1e0] ss:$16 sps:$4 sm:$0xff]  }
 0x135   : > { %v483_v51 = vadd.f32 %v1735_v49, %v2253_v14  ;;  %v474_v52 = vpop.f32.mrb[9].mxu0  ;;  %1233 = vmatpush1.bf16.msra.mxu0 %v1915_v38 }
 0x136   : > { %680 = vmatmul.mubr.bf16.gmra.mrb[4].mxu1 %v522_v27  ;;  %v475_v53 = vadd.f32 %v2253_v14, %v474_v52  ;;  %v1736_v54 = vpop.f32.mrb[10].mxu0  ;;  %v1890_v27 = vld [vmem:[#allocation2 + $0x14c] ss:$16 sps:$4 sm:$0xff]   ;;  %1234 = vmatprep.subr.bf16.mxu0 %v1923_v40 }
 0x137   : > { %689 = vmatprep.mubr.bf16.mxu1 %v2023_v48  ;;  %v515_v55 = vmax.f32 %v483_v51, 0.0  ;;  %v486_v56 = vadd.f32 %v1736_v54, %v2253_v14  ;;  %v477_v57 = vpop.f32.mrb[11].mxu0  ;;  %1322 = vmatpush1.bf16.msra.mxu1 %v1840_v46 }
 0x138   : > { %v513_v59 = vmax.f32 %v475_v53, 0.0  ;;  %v478_v60 = vadd.f32 %v2253_v14, %v477_v57  ;;  %1323 = vmatprep.subr.bf16.mxu1 %v1848_v50 }
 0x139   : > { %v516_v62 = vmax.f32 %v486_v56, 0.0  ;;  %1235 = vmatpush1.bf16.msra.mxu0 %v1921_v42 }
 0x13a   : > { %v514_v63 = vmax.f32 %v478_v60, 0.0 }
 0x13b   : > { %v526_v0 = vpack.c.bf16 %v516_v62, %v515_v55  ;;  %1324 = vmatpush1.bf16.msra.mxu1 %v1846_v58 }
 0x13c   : > { %v525_v2 = vpack.c.bf16 %v514_v63, %v513_v59  ;;  %v1739_v3 = vpop.f32.mrb[12].mxu0  ;;  %1325 = vmatprep.subr.bf16.mxu1 %v1854_v61 }
 0x13d   : > { %v499_v5 = vadd.f32 %v1739_v3, %v2253_v14  ;;  %v490_v6 = vpop.f32.mrb[13].mxu0 }
 0x13e   : > { %690 = vmatmul.mubr.bf16.gmra.mrb[8].mxu1 %v523_v47  ;;  %v491_v7 = vadd.f32 %v2253_v14, %v490_v6  ;;  %v1740_v8 = vpop.f32.mrb[14].mxu0 }
 0x13f   : > { %699 = vmatprep.mubr.bf16.mxu1 %v2023_v48  ;;  %v519_v9 = vmax.f32 %v499_v5, 0.0  ;;  %v502_v10 = vadd.f32 %v1740_v8, %v2253_v14  ;;  %v493_v11 = vpop.f32.mrb[15].mxu0  ;;  %1326 = vmatpush1.bf16.msra.mxu1 %v1852_v1 }
 0x140   : > { %v517_v13 = vmax.f32 %v491_v7, 0.0  ;;  %v494_v15 = vadd.f32 %v2253_v14, %v493_v11  ;;  %1327 = vmatprep.subr.bf16.mxu1 %v1860_v4  ;;  %v1884_v14 = vld [vmem:[#allocation2 + $0x12c] ss:$16 sps:$4 sm:$0xff]  }
 0x141   : > { %v520_v17 = vmax.f32 %v502_v10, 0.0 }
 0x142   : > { %v518_v18 = vmax.f32 %v494_v15, 0.0 }
 0x143   : > { %v528_v19 = vpack.c.bf16 %v520_v17, %v519_v9  ;;  %1328 = vmatpush1.bf16.msra.mxu1 %v1858_v12 }
 0x144   : > { %v527_v21 = vpack.c.bf16 %v518_v18, %v517_v13  ;;  %1329 = vmatprep.subr.bf16.mxu1 %v1866_v16 }
 0x146   : > { %700 = vmatmul.mubr.bf16.gmra.mrb[12].mxu1 %v524_v45  ;;  %v545_v45 = vld [vmem:[%s2531_s4] sm:$0x3] }
 0x147   : > { %709 = vmatprep.mubr.bf16.mxu1 %v2023_v48  ;;  %1330 = vmatpush1.bf16.msra.mxu1 %v1864_v20 }
 0x148   : > { %1331 = vmatprep.subr.bf16.mxu1 %v1872_v22 }
 0x14b   : > { %1332 = vmatpush1.bf16.msra.mxu1 %v1870_v23 }
 0x14c   : > { %1333 = vmatprep.subr.bf16.mxu1 %v1878_v24 }
 0x14e   : > { %710 = vmatmul.mubr.bf16.gmra.mrb[16].mxu1 %v525_v2 }
 0x14f   : > { %719 = vmatprep.mubr.bf16.mxu1 %v2023_v48  ;;  %1334 = vmatpush1.bf16.msra.mxu1 %v1876_v25 }
 0x150   : > { %1335 = vmatprep.subr.bf16.mxu1 %v1884_v14 }
 0x153   : > { %1336 = vmatpush1.bf16.msra.mxu1 %v1882_v26 }
 0x154   : > { %1337 = vmatprep.subr.bf16.mxu1 %v1890_v27 }
 0x156   : > { %720 = vmatmul.mubr.bf16.gmra.mrb[20].mxu1 %v526_v0 }
 0x157   : > { %729 = vmatprep.mubr.bf16.mxu1 %v2023_v48  ;;  %1338 = vmatpush1.bf16.msra.mxu1 %v1888_v28 }
 0x158   : > { %1339 = vmatprep.subr.bf16.mxu1 %v1896_v29 }
 0x15b   : > { %1340 = vmatpush1.bf16.msra.mxu1 %v1894_v30 }
 0x15c   : > { %1341 = vmatprep.subr.bf16.mxu1 %v1902_v31 }
 0x15e   : > { %730 = vmatmul.mubr.bf16.gmra.mrb[24].mxu1 %v527_v21 }
 0x15f   : > { %739 = vmatprep.mubr.bf16.mxu1 %v2023_v48  ;;  %1342 = vmatpush1.bf16.msra.mxu1 %v1900_v32  ;;  %v547_v48 = vlaneseq }
 0x160   : > { %1343 = vmatprep.subr.bf16.mxu1 %v1908_v33 }
 0x161   : > { %v2278_v43 = vshrl.u32 %v547_v48, 7 }
 0x163   : > { %1344 = vmatpush1.bf16.msra.mxu1 %v1906_v34  ;;  %v549_v44 = vsub.s32 0, %v2278_v43  ;;  %v553_v46 = vsub.s32 1, %v2278_v43 }
 0x164   : > { %1345 = vmatprep.subr.bf16.mxu1 %v1914_v35 }
 0x165   : > { %v2287_v47 = vrot.slane %v545_v45, %v549_v44  ;;  %v2291_v49 = vrot.slane %v545_v45, %v553_v46 }
 0x166   : > { %740 = vmatmul.mubr.bf16.gmra.mrb[28].mxu1 %v528_v19 }
 0x167   : > { %1346 = vmatpush1.bf16.msra.mxu1 %v1912_v37 }
 0x168   : > { %1347 = vmatprep.subr.bf16.mxu1 %v1920_v39 }
 0x16b   : > { %1348 = vmatpush1.bf16.msra.mxu1 %v1918_v41 }
 0x201   : > { %v671_v50 = vpop.f32.mrb[0].mxu1 }
 0x202   : > { %v672_v51 = vadd.f32 %v671_v50, %v2287_v47  ;;  %v673_v52 = vpop.f32.mrb[1].mxu1 }
 0x203   : > { %v674_v53 = vadd.f32 %v673_v52, %v2291_v49  ;;  %v675_v54 = vpop.f32.mrb[2].mxu1 }
 0x204   : > { %v676_v55 = vadd.f32 %v675_v54, %v2287_v47  ;;  %v677_v56 = vpop.f32.mrb[3].mxu1  ;;  %v750_v58 = vmax.f32 %v672_v51, 0.0 }
 0x205   : > { %v678_v57 = vadd.f32 %v677_v56, %v2291_v49  ;;  %v751_v60 = vmax.f32 %v674_v53, 0.0 }
 0x206   : > { %v752_v59 = vmax.f32 %v676_v55, 0.0 }
 0x207   : > { %v753_v61 = vmax.f32 %v678_v57, 0.0 }
 0x208   : > { %v782_v62 = vpack.c.bf16 %v752_v59, %v750_v58 }
 0x209   : > { %v783_v63 = vpack.c.bf16 %v753_v61, %v751_v60  ;;  %v681_v0 = vpop.f32.mrb[4].mxu1 }
 0x20a   : > { %v682_v1 = vadd.f32 %v681_v0, %v2287_v47  ;;  %v683_v2 = vpop.f32.mrb[5].mxu1 }
 0x20b   : > { %v684_v3 = vadd.f32 %v683_v2, %v2291_v49  ;;  %v685_v4 = vpop.f32.mrb[6].mxu1  ;;  %1236 = vmatprep.mubr.bf16.mxu0 %v783_v63  ;;  %1349 = vmatprep.mubr.bf16.mxu1 %v783_v63 }
 0x20c   : > { %v686_v5 = vadd.f32 %v685_v4, %v2287_v47  ;;  %v687_v6 = vpop.f32.mrb[7].mxu1  ;;  %1237 = vmatmul.mubr.bf16.vlgmr.msra.gmra.mrb[16].mxu0 %v782_v62  ;;  %1350 = vmatmul.mubr.bf16.vlgmr.msra.gmra.mrb[32].mxu1 %v782_v62  ;;  %v754_v8 = vmax.f32 %v682_v1, 0.0 }
 0x20d   : > { %v688_v7 = vadd.f32 %v687_v6, %v2291_v49  ;;  %v755_v10 = vmax.f32 %v684_v3, 0.0 }
 0x20e   : > { %v756_v9 = vmax.f32 %v686_v5, 0.0 }
 0x20f   : > { %v757_v11 = vmax.f32 %v688_v7, 0.0 }
 0x210   : > { %v784_v12 = vpack.c.bf16 %v756_v9, %v754_v8 }
 0x211   : > { %v785_v13 = vpack.c.bf16 %v757_v11, %v755_v10  ;;  %v691_v15 = vpop.f32.mrb[8].mxu1 }
 0x212   : > { %v692_v16 = vadd.f32 %v691_v15, %v2287_v47  ;;  %v693_v17 = vpop.f32.mrb[9].mxu1 }
 0x213   : > { %v694_v18 = vadd.f32 %v693_v17, %v2291_v49  ;;  %v695_v19 = vpop.f32.mrb[10].mxu1  ;;  %1246 = vmatprep.mubr.bf16.mxu0 %v785_v13  ;;  %1359 = vmatprep.mubr.bf16.mxu1 %v785_v13 }
 0x214   : > { %v696_v20 = vadd.f32 %v695_v19, %v2287_v47  ;;  %v697_v21 = vpop.f32.mrb[11].mxu1  ;;  %1247 = vmatmul.mubr.bf16.gmra.mrb[20].mxu0 %v784_v12  ;;  %1360 = vmatmul.mubr.bf16.gmra.mrb[36].mxu1 %v784_v12  ;;  %v758_v23 = vmax.f32 %v692_v16, 0.0 }
 0x215   : > { %v698_v22 = vadd.f32 %v697_v21, %v2291_v49  ;;  %v759_v25 = vmax.f32 %v694_v18, 0.0 }
 0x216   : > { %v760_v24 = vmax.f32 %v696_v20, 0.0 }
 0x217   : > { %v761_v14 = vmax.f32 %v698_v22, 0.0 }
 0x218   : > { %v786_v26 = vpack.c.bf16 %v760_v24, %v758_v23 }
 0x219   : > { %v787_v27 = vpack.c.bf16 %v761_v14, %v759_v25  ;;  %v701_v28 = vpop.f32.mrb[12].mxu1 }
 0x21a   : > { %v702_v29 = vadd.f32 %v701_v28, %v2287_v47  ;;  %v703_v30 = vpop.f32.mrb[13].mxu1 }
 0x21b   : > { %v704_v31 = vadd.f32 %v703_v30, %v2291_v49  ;;  %v705_v32 = vpop.f32.mrb[14].mxu1  ;;  %1256 = vmatprep.mubr.bf16.mxu0 %v787_v27  ;;  %1369 = vmatprep.mubr.bf16.mxu1 %v787_v27 }
 0x21c   : > { %v706_v33 = vadd.f32 %v705_v32, %v2287_v47  ;;  %v707_v34 = vpop.f32.mrb[15].mxu1  ;;  %1257 = vmatmul.mubr.bf16.gmra.mrb[24].mxu0 %v786_v26  ;;  %1370 = vmatmul.mubr.bf16.gmra.mrb[40].mxu1 %v786_v26  ;;  %v762_v36 = vmax.f32 %v702_v29, 0.0 }
 0x21d   : > { %v708_v35 = vadd.f32 %v707_v34, %v2291_v49  ;;  %v763_v38 = vmax.f32 %v704_v31, 0.0 }
 0x21e   : > { %v764_v37 = vmax.f32 %v706_v33, 0.0 }
 0x21f   : > { %v765_v39 = vmax.f32 %v708_v35, 0.0 }
 0x220   : > { %v788_v40 = vpack.c.bf16 %v764_v37, %v762_v36 }
 0x221   : > { %v789_v41 = vpack.c.bf16 %v765_v39, %v763_v38  ;;  %v711_v42 = vpop.f32.mrb[16].mxu1  ;;  %v874_v39 = vsub.s32 2, %v2278_v43 }
 0x222   : > { %v712_v48 = vadd.f32 %v711_v42, %v2287_v47  ;;  %v713_v45 = vpop.f32.mrb[17].mxu1 }
 0x223   : > { %v714_v50 = vadd.f32 %v713_v45, %v2291_v49  ;;  %v715_v51 = vpop.f32.mrb[18].mxu1  ;;  %1266 = vmatprep.mubr.bf16.mxu0 %v789_v41  ;;  %1379 = vmatprep.mubr.bf16.mxu1 %v789_v41 }
 0x224   : > { %v716_v52 = vadd.f32 %v715_v51, %v2287_v47  ;;  %v717_v53 = vpop.f32.mrb[19].mxu1  ;;  %1267 = vmatmul.mubr.bf16.gmra.mrb[28].mxu0 %v788_v40  ;;  %1380 = vmatmul.mubr.bf16.gmra.mrb[44].mxu1 %v788_v40  ;;  %v766_v55 = vmax.f32 %v712_v48, 0.0  ;;  %v878_v40 = vsub.s32 3, %v2278_v43 }
 0x225   : > { %v718_v54 = vadd.f32 %v717_v53, %v2291_v49  ;;  %v767_v57 = vmax.f32 %v714_v50, 0.0 }
 0x226   : > { %v768_v56 = vmax.f32 %v716_v52, 0.0 }
 0x227   : > { %v769_v58 = vmax.f32 %v718_v54, 0.0 }
 0x228   : > { %v790_v59 = vpack.c.bf16 %v768_v56, %v766_v55 }
 0x229   : > { %v791_v60 = vpack.c.bf16 %v769_v58, %v767_v57  ;;  %v721_v61 = vpop.f32.mrb[20].mxu1 }
 0x22a   : > { %v722_v62 = vadd.f32 %v721_v61, %v2287_v47  ;;  %v723_v63 = vpop.f32.mrb[21].mxu1 }
 0x22b   : > { %v724_v0 = vadd.f32 %v723_v63, %v2291_v49  ;;  %v725_v1 = vpop.f32.mrb[22].mxu1  ;;  %1276 = vmatprep.mubr.bf16.mxu0 %v791_v60  ;;  %1389 = vmatprep.mubr.bf16.mxu1 %v791_v60 }
 0x22c   : > { %v726_v2 = vadd.f32 %v725_v1, %v2287_v47  ;;  %v727_v3 = vpop.f32.mrb[23].mxu1  ;;  %1277 = vmatmul.mubr.bf16.gmra.mrb[32].mxu0 %v790_v59  ;;  %1390 = vmatmul.mubr.bf16.gmra.mrb[48].mxu1 %v790_v59  ;;  %v770_v5 = vmax.f32 %v722_v62, 0.0 }
 0x22d   : > { %v728_v4 = vadd.f32 %v727_v3, %v2291_v49  ;;  %v771_v7 = vmax.f32 %v724_v0, 0.0 }
 0x22e   : > { %v772_v6 = vmax.f32 %v726_v2, 0.0 }
 0x22f   : > { %v773_v8 = vmax.f32 %v728_v4, 0.0 }
 0x230   : > { %v792_v9 = vpack.c.bf16 %v772_v6, %v770_v5 }
 0x231   : > { %v793_v10 = vpack.c.bf16 %v773_v8, %v771_v7  ;;  %v731_v11 = vpop.f32.mrb[24].mxu1 }
 0x232   : > { %v732_v12 = vadd.f32 %v731_v11, %v2287_v47  ;;  %v733_v13 = vpop.f32.mrb[25].mxu1 }
 0x233   : > { %v734_v15 = vadd.f32 %v733_v13, %v2291_v49  ;;  %v735_v16 = vpop.f32.mrb[26].mxu1  ;;  %1286 = vmatprep.mubr.bf16.mxu0 %v793_v10  ;;  %1399 = vmatprep.mubr.bf16.mxu1 %v793_v10 }
 0x234   : > { %v736_v17 = vadd.f32 %v735_v16, %v2287_v47  ;;  %v737_v18 = vpop.f32.mrb[27].mxu1  ;;  %1287 = vmatmul.mubr.bf16.gmra.mrb[36].mxu0 %v792_v9  ;;  %1400 = vmatmul.mubr.bf16.gmra.mrb[52].mxu1 %v792_v9  ;;  %v774_v20 = vmax.f32 %v732_v12, 0.0 }
 0x235   : > { %v738_v19 = vadd.f32 %v737_v18, %v2291_v49  ;;  %v775_v22 = vmax.f32 %v734_v15, 0.0 }
 0x236   : > { %v776_v21 = vmax.f32 %v736_v17, 0.0 }
 0x237   : > { %v777_v23 = vmax.f32 %v738_v19, 0.0 }
 0x238   : > { %v794_v24 = vpack.c.bf16 %v776_v21, %v774_v20 }
 0x239   : > { %v795_v25 = vpack.c.bf16 %v777_v23, %v775_v22  ;;  %v741_v14 = vpop.f32.mrb[28].mxu1 }
 0x23a   : > { %v742_v26 = vadd.f32 %v741_v14, %v2287_v47  ;;  %v743_v27 = vpop.f32.mrb[29].mxu1 }
 0x23b   : > { %v744_v28 = vadd.f32 %v743_v27, %v2291_v49  ;;  %v745_v29 = vpop.f32.mrb[30].mxu1  ;;  %1296 = vmatprep.mubr.bf16.mxu0 %v795_v25  ;;  %1409 = vmatprep.mubr.bf16.mxu1 %v795_v25 }
 0x23c   : > { %v746_v30 = vadd.f32 %v745_v29, %v2287_v47  ;;  %v747_v31 = vpop.f32.mrb[31].mxu1  ;;  %1297 = vmatmul.mubr.bf16.gmra.mrb[40].mxu0 %v794_v24  ;;  %1410 = vmatmul.mubr.bf16.gmra.mrb[56].mxu1 %v794_v24  ;;  %v778_v33 = vmax.f32 %v742_v26, 0.0  ;;  %v862_v47 = vld [vmem:[%s2533_s6] sm:$0xf] }
 0x23d   : > { %v748_v32 = vadd.f32 %v747_v31, %v2291_v49  ;;  %v779_v35 = vmax.f32 %v744_v28, 0.0  ;;  %v2335_v49 = vrot.slane %v862_v47, %v549_v44  ;;  %v2337_v41 = vrot.slane %v862_v47, %v874_v39 }
 0x23e   : > { %v780_v34 = vmax.f32 %v746_v30, 0.0  ;;  %v2341_v42 = vrot.slane %v862_v47, %v553_v46  ;;  %v2343_v48 = vrot.slane %v862_v47, %v878_v40 }
 0x23f   : > { %v781_v36 = vmax.f32 %v748_v32, 0.0 }
 0x240   : > { %v796_v37 = vpack.c.bf16 %v780_v34, %v778_v33 }
 0x241   : > { %v797_v38 = vpack.c.bf16 %v781_v36, %v779_v35 }
 0x243   : > { %1306 = vmatprep.mubr.bf16.mxu0 %v797_v38  ;;  %1419 = vmatprep.mubr.bf16.mxu1 %v797_v38 }
 0x244   : > { %1307 = vmatmul.mubr.bf16.gmra.mrb[44].mxu0 %v796_v37  ;;  %1420 = vmatmul.mubr.bf16.gmra.mrb[60].mxu1 %v796_v37 }
 0x2df   : > { %v1238_v45 = vpop.f32.mrb[16].mxu0  ;;  %v1351_v50 = vpop.f32.mrb[32].mxu1 }
 0x2e0   : > { %v1239_v51 = vadd.f32 %v1238_v45, %v2335_v49  ;;  %v1352_v52 = vadd.f32 %v1351_v50, %v2337_v41  ;;  %v1240_v53 = vpop.f32.mrb[17].mxu0  ;;  %v1353_v54 = vpop.f32.mrb[33].mxu1 }
 0x2e1   : > { %v1241_v55 = vadd.f32 %v1240_v53, %v2341_v42  ;;  %v1354_v44 = vadd.f32 %v1353_v54, %v2343_v48  ;;  %v1242_v56 = vpop.f32.mrb[18].mxu0  ;;  %v1355_v57 = vpop.f32.mrb[34].mxu1 }
 0x2e2   : > { %1430 = vst [vmem:[%s2349_s15] sm:$0xff] %v1239_v51  ;;  %1432 = vst [vmem:[%s2349_s15 + $0x10] sm:$0xff] %v1352_v52  ;;  %v1243_v43 = vadd.f32 %v1242_v56, %v2335_v49  ;;  %v1356_v46 = vadd.f32 %v1355_v57, %v2337_v41  ;;  %v1244_v58 = vpop.f32.mrb[19].mxu0  ;;  %v1357_v59 = vpop.f32.mrb[35].mxu1 }
 0x2e3   : > { %1431 = vst [vmem:[%s2349_s15 + $0x8] sm:$0xff] %v1241_v55  ;;  %1433 = vst [vmem:[%s2349_s15 + $0x18] sm:$0xff] %v1354_v44  ;;  %v1245_v60 = vadd.f32 %v1244_v58, %v2341_v42  ;;  %v1358_v61 = vadd.f32 %v1357_v59, %v2343_v48 }
 0x2e4   : > { %1434 = vst [vmem:[%s2349_s15 + $0x20] sm:$0xff] %v1243_v43  ;;  %1436 = vst [vmem:[%s2349_s15 + $0x30] sm:$0xff] %v1356_v46 }
 0x2e5   : > { %1435 = vst [vmem:[%s2349_s15 + $0x28] sm:$0xff] %v1245_v60  ;;  %1437 = vst [vmem:[%s2349_s15 + $0x38] sm:$0xff] %v1358_v61 }
 0x2e7   : > { %v1248_v62 = vpop.f32.mrb[20].mxu0  ;;  %v1361_v63 = vpop.f32.mrb[36].mxu1 }
 0x2e8   : > { %v1249_v0 = vadd.f32 %v1248_v62, %v2335_v49  ;;  %v1362_v1 = vadd.f32 %v1361_v63, %v2337_v41  ;;  %v1250_v2 = vpop.f32.mrb[21].mxu0  ;;  %v1363_v3 = vpop.f32.mrb[37].mxu1 }
 0x2e9   : > { %v1251_v4 = vadd.f32 %v1250_v2, %v2341_v42  ;;  %v1364_v5 = vadd.f32 %v1363_v3, %v2343_v48  ;;  %v1252_v6 = vpop.f32.mrb[22].mxu0  ;;  %v1365_v7 = vpop.f32.mrb[38].mxu1 }
 0x2ea   : > { %1438 = vst [vmem:[%s2349_s15 + $0x40] sm:$0xff] %v1249_v0  ;;  %1440 = vst [vmem:[%s2349_s15 + $0x50] sm:$0xff] %v1362_v1  ;;  %v1253_v8 = vadd.f32 %v1252_v6, %v2335_v49  ;;  %v1366_v9 = vadd.f32 %v1365_v7, %v2337_v41  ;;  %v1254_v10 = vpop.f32.mrb[23].mxu0  ;;  %v1367_v11 = vpop.f32.mrb[39].mxu1 }
 0x2eb   : > { %1439 = vst [vmem:[%s2349_s15 + $0x48] sm:$0xff] %v1251_v4  ;;  %1441 = vst [vmem:[%s2349_s15 + $0x58] sm:$0xff] %v1364_v5  ;;  %v1255_v12 = vadd.f32 %v1254_v10, %v2341_v42  ;;  %v1368_v13 = vadd.f32 %v1367_v11, %v2343_v48 }
 0x2ec   : > { %1442 = vst [vmem:[%s2349_s15 + $0x60] sm:$0xff] %v1253_v8  ;;  %1444 = vst [vmem:[%s2349_s15 + $0x70] sm:$0xff] %v1366_v9 }
 0x2ed   : > { %1443 = vst [vmem:[%s2349_s15 + $0x68] sm:$0xff] %v1255_v12  ;;  %1445 = vst [vmem:[%s2349_s15 + $0x78] sm:$0xff] %v1368_v13 }
 0x2ef   : > { %v1258_v15 = vpop.f32.mrb[24].mxu0  ;;  %v1371_v16 = vpop.f32.mrb[40].mxu1 }
 0x2f0   : > { %v1259_v17 = vadd.f32 %v1258_v15, %v2335_v49  ;;  %v1372_v18 = vadd.f32 %v1371_v16, %v2337_v41  ;;  %v1260_v19 = vpop.f32.mrb[25].mxu0  ;;  %v1373_v20 = vpop.f32.mrb[41].mxu1 }
 0x2f1   : > { %v1261_v21 = vadd.f32 %v1260_v19, %v2341_v42  ;;  %v1374_v22 = vadd.f32 %v1373_v20, %v2343_v48  ;;  %v1262_v23 = vpop.f32.mrb[26].mxu0  ;;  %v1375_v24 = vpop.f32.mrb[42].mxu1 }
 0x2f2   : > { %1446 = vst [vmem:[%s2349_s15 + $0x80] sm:$0xff] %v1259_v17  ;;  %1448 = vst [vmem:[%s2349_s15 + $0x90] sm:$0xff] %v1372_v18  ;;  %v1263_v25 = vadd.f32 %v1262_v23, %v2335_v49  ;;  %v1376_v14 = vadd.f32 %v1375_v24, %v2337_v41  ;;  %v1264_v26 = vpop.f32.mrb[27].mxu0  ;;  %v1377_v27 = vpop.f32.mrb[43].mxu1 }
 0x2f3   : > { %1447 = vst [vmem:[%s2349_s15 + $0x88] sm:$0xff] %v1261_v21  ;;  %1449 = vst [vmem:[%s2349_s15 + $0x98] sm:$0xff] %v1374_v22  ;;  %v1265_v28 = vadd.f32 %v1264_v26, %v2341_v42  ;;  %v1378_v29 = vadd.f32 %v1377_v27, %v2343_v48 }
 0x2f4   : > { %1450 = vst [vmem:[%s2349_s15 + $0xa0] sm:$0xff] %v1263_v25  ;;  %1452 = vst [vmem:[%s2349_s15 + $0xb0] sm:$0xff] %v1376_v14 }
 0x2f5   : > { %1451 = vst [vmem:[%s2349_s15 + $0xa8] sm:$0xff] %v1265_v28  ;;  %1453 = vst [vmem:[%s2349_s15 + $0xb8] sm:$0xff] %v1378_v29 }
 0x2f7   : > { %v1268_v30 = vpop.f32.mrb[28].mxu0  ;;  %v1381_v31 = vpop.f32.mrb[44].mxu1 }
 0x2f8   : > { %v1269_v32 = vadd.f32 %v1268_v30, %v2335_v49  ;;  %v1382_v33 = vadd.f32 %v1381_v31, %v2337_v41  ;;  %v1270_v34 = vpop.f32.mrb[29].mxu0  ;;  %v1383_v35 = vpop.f32.mrb[45].mxu1 }
 0x2f9   : > { %v1271_v36 = vadd.f32 %v1270_v34, %v2341_v42  ;;  %v1384_v37 = vadd.f32 %v1383_v35, %v2343_v48  ;;  %v1272_v38 = vpop.f32.mrb[30].mxu0  ;;  %v1385_v39 = vpop.f32.mrb[46].mxu1 }
 0x2fa   : > { %1454 = vst [vmem:[%s2349_s15 + $0xc0] sm:$0xff] %v1269_v32  ;;  %1456 = vst [vmem:[%s2349_s15 + $0xd0] sm:$0xff] %v1382_v33  ;;  %v1273_v47 = vadd.f32 %v1272_v38, %v2335_v49  ;;  %v1386_v40 = vadd.f32 %v1385_v39, %v2337_v41  ;;  %v1274_v45 = vpop.f32.mrb[31].mxu0  ;;  %v1387_v50 = vpop.f32.mrb[47].mxu1 }
 0x2fb   : > { %1455 = vst [vmem:[%s2349_s15 + $0xc8] sm:$0xff] %v1271_v36  ;;  %1457 = vst [vmem:[%s2349_s15 + $0xd8] sm:$0xff] %v1384_v37  ;;  %v1275_v51 = vadd.f32 %v1274_v45, %v2341_v42  ;;  %v1388_v52 = vadd.f32 %v1387_v50, %v2343_v48 }
 0x2fc   : > { %1458 = vst [vmem:[%s2349_s15 + $0xe0] sm:$0xff] %v1273_v47  ;;  %1460 = vst [vmem:[%s2349_s15 + $0xf0] sm:$0xff] %v1386_v40 }
 0x2fd   : > { %1459 = vst [vmem:[%s2349_s15 + $0xe8] sm:$0xff] %v1275_v51  ;;  %1461 = vst [vmem:[%s2349_s15 + $0xf8] sm:$0xff] %v1388_v52 }
 0x2ff   : > { %v1278_v53 = vpop.f32.mrb[32].mxu0  ;;  %v1391_v54 = vpop.f32.mrb[48].mxu1 }
 0x300   : > { %v1279_v55 = vadd.f32 %v1278_v53, %v2335_v49  ;;  %v1392_v44 = vadd.f32 %v1391_v54, %v2337_v41  ;;  %v1280_v56 = vpop.f32.mrb[33].mxu0  ;;  %v1393_v57 = vpop.f32.mrb[49].mxu1 }
 0x301   : > { %v1281_v43 = vadd.f32 %v1280_v56, %v2341_v42  ;;  %v1394_v46 = vadd.f32 %v1393_v57, %v2343_v48  ;;  %v1282_v58 = vpop.f32.mrb[34].mxu0  ;;  %v1395_v59 = vpop.f32.mrb[50].mxu1 }
 0x302   : > { %1462 = vst [vmem:[%s2349_s15 + $0x100] sm:$0xff] %v1279_v55  ;;  %1464 = vst [vmem:[%s2349_s15 + $0x110] sm:$0xff] %v1392_v44  ;;  %v1283_v60 = vadd.f32 %v1282_v58, %v2335_v49  ;;  %v1396_v61 = vadd.f32 %v1395_v59, %v2337_v41  ;;  %v1284_v62 = vpop.f32.mrb[35].mxu0  ;;  %v1397_v63 = vpop.f32.mrb[51].mxu1 }
 0x303   : > { %1463 = vst [vmem:[%s2349_s15 + $0x108] sm:$0xff] %v1281_v43  ;;  %1465 = vst [vmem:[%s2349_s15 + $0x118] sm:$0xff] %v1394_v46  ;;  %v1285_v0 = vadd.f32 %v1284_v62, %v2341_v42  ;;  %v1398_v1 = vadd.f32 %v1397_v63, %v2343_v48 }
 0x304   : > { %1466 = vst [vmem:[%s2349_s15 + $0x120] sm:$0xff] %v1283_v60  ;;  %1468 = vst [vmem:[%s2349_s15 + $0x130] sm:$0xff] %v1396_v61 }
 0x305   : > { %1467 = vst [vmem:[%s2349_s15 + $0x128] sm:$0xff] %v1285_v0  ;;  %1469 = vst [vmem:[%s2349_s15 + $0x138] sm:$0xff] %v1398_v1 }
 0x307   : > { %v1288_v2 = vpop.f32.mrb[36].mxu0  ;;  %v1401_v3 = vpop.f32.mrb[52].mxu1 }
 0x308   : > { %v1289_v4 = vadd.f32 %v1288_v2, %v2335_v49  ;;  %v1402_v5 = vadd.f32 %v1401_v3, %v2337_v41  ;;  %v1290_v6 = vpop.f32.mrb[37].mxu0  ;;  %v1403_v7 = vpop.f32.mrb[53].mxu1 }
 0x309   : > { %v1291_v8 = vadd.f32 %v1290_v6, %v2341_v42  ;;  %v1404_v9 = vadd.f32 %v1403_v7, %v2343_v48  ;;  %v1292_v10 = vpop.f32.mrb[38].mxu0  ;;  %v1405_v11 = vpop.f32.mrb[54].mxu1 }
 0x30a   : > { %1470 = vst [vmem:[%s2349_s15 + $0x140] sm:$0xff] %v1289_v4  ;;  %1472 = vst [vmem:[%s2349_s15 + $0x150] sm:$0xff] %v1402_v5  ;;  %v1293_v12 = vadd.f32 %v1292_v10, %v2335_v49  ;;  %v1406_v13 = vadd.f32 %v1405_v11, %v2337_v41  ;;  %v1294_v15 = vpop.f32.mrb[39].mxu0  ;;  %v1407_v16 = vpop.f32.mrb[55].mxu1 }
 0x30b   : > { %1471 = vst [vmem:[%s2349_s15 + $0x148] sm:$0xff] %v1291_v8  ;;  %1473 = vst [vmem:[%s2349_s15 + $0x158] sm:$0xff] %v1404_v9  ;;  %v1295_v17 = vadd.f32 %v1294_v15, %v2341_v42  ;;  %v1408_v18 = vadd.f32 %v1407_v16, %v2343_v48 }
 0x30c   : > { %1474 = vst [vmem:[%s2349_s15 + $0x160] sm:$0xff] %v1293_v12  ;;  %1476 = vst [vmem:[%s2349_s15 + $0x170] sm:$0xff] %v1406_v13 }
 0x30d   : > { %1475 = vst [vmem:[%s2349_s15 + $0x168] sm:$0xff] %v1295_v17  ;;  %1477 = vst [vmem:[%s2349_s15 + $0x178] sm:$0xff] %v1408_v18 }
 0x30f   : > { %v1298_v19 = vpop.f32.mrb[40].mxu0  ;;  %v1411_v20 = vpop.f32.mrb[56].mxu1 }
 0x310   : > { %v1299_v21 = vadd.f32 %v1298_v19, %v2335_v49  ;;  %v1412_v22 = vadd.f32 %v1411_v20, %v2337_v41  ;;  %v1300_v23 = vpop.f32.mrb[41].mxu0  ;;  %v1413_v24 = vpop.f32.mrb[57].mxu1 }
 0x311   : > { %v1301_v25 = vadd.f32 %v1300_v23, %v2341_v42  ;;  %v1414_v14 = vadd.f32 %v1413_v24, %v2343_v48  ;;  %v1302_v26 = vpop.f32.mrb[42].mxu0  ;;  %v1415_v27 = vpop.f32.mrb[58].mxu1 }
 0x312   : > { %1478 = vst [vmem:[%s2349_s15 + $0x180] sm:$0xff] %v1299_v21  ;;  %1480 = vst [vmem:[%s2349_s15 + $0x190] sm:$0xff] %v1412_v22  ;;  %v1303_v28 = vadd.f32 %v1302_v26, %v2335_v49  ;;  %v1416_v29 = vadd.f32 %v1415_v27, %v2337_v41  ;;  %v1304_v30 = vpop.f32.mrb[43].mxu0  ;;  %v1417_v31 = vpop.f32.mrb[59].mxu1 }
 0x313   : > { %1479 = vst [vmem:[%s2349_s15 + $0x188] sm:$0xff] %v1301_v25  ;;  %1481 = vst [vmem:[%s2349_s15 + $0x198] sm:$0xff] %v1414_v14  ;;  %v1305_v32 = vadd.f32 %v1304_v30, %v2341_v42  ;;  %v1418_v33 = vadd.f32 %v1417_v31, %v2343_v48 }
 0x314   : > { %1482 = vst [vmem:[%s2349_s15 + $0x1a0] sm:$0xff] %v1303_v28  ;;  %1484 = vst [vmem:[%s2349_s15 + $0x1b0] sm:$0xff] %v1416_v29 }
 0x315   : > { %1483 = vst [vmem:[%s2349_s15 + $0x1a8] sm:$0xff] %v1305_v32  ;;  %1485 = vst [vmem:[%s2349_s15 + $0x1b8] sm:$0xff] %v1418_v33 }
 0x317   : > { %v1308_v34 = vpop.f32.mrb[44].mxu0  ;;  %v1421_v35 = vpop.f32.mrb[60].mxu1 }
 0x318   : > { %v1309_v36 = vadd.f32 %v1308_v34, %v2335_v49  ;;  %v1422_v37 = vadd.f32 %v1421_v35, %v2337_v41  ;;  %v1310_v38 = vpop.f32.mrb[45].mxu0  ;;  %v1423_v39 = vpop.f32.mrb[61].mxu1 }
 0x319   : > { %v1311_v47 = vadd.f32 %v1310_v38, %v2341_v42  ;;  %v1424_v40 = vadd.f32 %v1423_v39, %v2343_v48  ;;  %v1312_v45 = vpop.f32.mrb[46].mxu0  ;;  %v1425_v50 = vpop.f32.mrb[62].mxu1 }
 0x31a   : > { %1486 = vst [vmem:[%s2349_s15 + $0x1c0] sm:$0xff] %v1309_v36  ;;  %1488 = vst [vmem:[%s2349_s15 + $0x1d0] sm:$0xff] %v1422_v37  ;;  %v1313_v51 = vadd.f32 %v1312_v45, %v2335_v49  ;;  %v1426_v52 = vadd.f32 %v1425_v50, %v2337_v41  ;;  %v1314_v53 = vpop.f32.mrb[47].mxu0  ;;  %v1427_v54 = vpop.f32.mrb[63].mxu1 }
 0x31b   : > { %1487 = vst [vmem:[%s2349_s15 + $0x1c8] sm:$0xff] %v1311_v47  ;;  %1489 = vst [vmem:[%s2349_s15 + $0x1d8] sm:$0xff] %v1424_v40  ;;  %v1315_v55 = vadd.f32 %v1314_v53, %v2341_v42  ;;  %v1428_v49 = vadd.f32 %v1427_v54, %v2343_v48 }
 0x31c   : > { %1490 = vst [vmem:[%s2349_s15 + $0x1e0] sm:$0xff] %v1313_v51  ;;  %1492 = vst [vmem:[%s2349_s15 + $0x1f0] sm:$0xff] %v1426_v52 }
 0x31d   : > { %1491 = vst [vmem:[%s2349_s15 + $0x1e8] sm:$0xff] %v1315_v55  ;;  %1493 = vst [vmem:[%s2349_s15 + $0x1f8] sm:$0xff] %v1428_v49 }
 0x31e   : > { %1965 = shalt.err (!%p1962_p7)
}
 0x31f   : > { %s1966_s19 = scalar_lea.hbm %s2472_s8, 8192  ;;  %s1970_s21 = scalar_lea.hbm %s2534_s7, 16384 }
 0x320   : > { %p1967_p8 = scmp.ne.s32.totalorder %s2472_s8, %s1966_s19  ;;  %p1971_p1 = scmp.lt.u32.totalorder %s2472_s8, %s2534_s7 }
 0x321   : > { %p1972_p0 = scmp.lt.u32.totalorder %s1970_s21, %s1966_s19  ;;  %p1974_p6 = scmp.lt.u32.totalorder %s1966_s19, %s2472_s8 }
 0x322   : > { %p1968_p11 = pnand %p1967_p8, %p2545_p9 }
 0x323   : > { %p1973_p5 = por %p1972_p0, %p1971_p1 }
 0x324   : > { %p1969_p13 = pneg %p1968_p11 }
 0x325   : > { %p1975_p10 = por %p1974_p6, %p1973_p5 }
 0x327   : > { %p1976_p12 = pnand %p1975_p10, %p1969_p13 }
 0x329   : > { %1979 = shalt.err (!%p1976_p12)
}
 0x32a   : > { %s2025_s28 = smov 512   ;;  %s2026_s29 = smov 32  }
 0x32b   : > { %1746 = dma.vmem_to_hbm [thread:$0]  (%p2545_p9), %s2474_s22, 8192, %s2472_s8, %s2486_s9, %s2025_s28, %s2025_s28, %s2026_s29  }
 0x32c PF: > { %p1758_p2 = scmp.ge.s32.totalorder %s2018_s27, 2  ;;  %s1524_s23 = sand.u32 1, %s2006_s24  }
 0x32d   : > { %p2546_p3 = scmp.ne.s32.totalorder %s2539_s12, 0  ;;  %s1525_s14 = scalar_lea.sflag [#allocation4], %s1524_s23 }
 0x32f   : > { %p1753_p4 = pnand %p1758_p2, %p2546_p3 }
 0x331   : > { %2001 = dma.done.wait (!%p1753_p4), %s1525_s14, 8192  }
 0x332   : > { %2003 = vsyncadd (!%p1753_p4), %s1525_s14, 4294959104  ;;  %p18_p7 = scmp.ge.s32.totalorder %s2092_s30, 4   ;;  %s2547_s24 = smov %s2010_s25 }
 0x333   : > { %s2548_s25 = smov %s2014_s26  ;;  %s2549_s26 = smov %s2103_s10 }
 0x334   : > { %s2550_s27 = smov %s2092_s30  ;;  %20 = sbr.rel (!%p18_p7) target bundleno = 4 (0x4), region = 88 }
 0x33b   :  { %1530 = vsyncpa [#allocation3], 1 }
 0x33c   :  { %1532 = vsyncpa [#allocation3 + $0x1], 1 }
 0x33d   :  { %1533 = vsyncpa [#allocation4], 1 }
 0x33e   :  { %1535 = vsyncpa [#allocation4 + $0x1], 1 }

</bundles_post_ra>
